<compile_context>
chip_gen: v6e
topology: v6e:2x2x1
jax: 0.10.0
libtpu: 0.0.40
codegen_flags: <defaults>
</compile_context>

<pallas_src>
import functools

import jax
import jax.numpy as jnp
import numpy as np
from jax.experimental import pallas as pl
from jax.experimental.pallas import tpu as pltpu

RESNET_UUID = "resnet_clip"
MAP_UUID = "aggregate_map_sensor"
RESNET_C = 8          # channels of the resnet/clip feature map (small synthetic)

# ---- pallas dispatch / tiling thresholds -----------------------------------
_MIN_M = 64                  # below these a pallas launch is pure overhead
_MIN_K = 64
_MIN_N = 32
_MIN_MACS = 1_000_000        # M*K*N must be at least ~1 MMAC for a launch
_SPLIT_MACS = 32_000_000     # per-call MACs before splitting into >=2 tiles
                             # (feeds both v7x TensorCores; don't split us-scale tiles)


def _round_up(x, m):
    return ((x + m - 1) // m) * m


def _apply_act(y, act):
    if act == "relu":
        return jnp.maximum(y, 0.0)
    if act == "leaky_relu":                       # PyTorch default negative slope
        return jnp.where(y >= 0.0, y, 0.01 * y)
    return y


# ---------------------------------------------------------------------------
# Pallas kernel: matmul with fused bias + activation
# (bf16 operands -> MXU, f32 accumulate, bf16 store)
# ---------------------------------------------------------------------------
def _mm_bias_act_kernel(x_ref, w_ref, b_ref, o_ref, *, act):
    y = jnp.dot(x_ref[...], w_ref[...], preferred_element_type=jnp.float32)
    y = _apply_act(y + b_ref[...], act)
    o_ref[...] = y.astype(o_ref.dtype)


def matmul_bias_act(x, w, b, act="none"):
    """x: (M, K) bf16 @ w: (K, N) bf16 + b: (1, N) f32 -> (M, N) bf16."""
    M, K = x.shape
    K2, N = w.shape
    assert K == K2
    macs = M * K * N

    use_pallas = (M >= _MIN_M) and (K >= _MIN_K) and (N >= _MIN_N) and (macs >= _MIN_MACS)
    if not use_pallas:
        # Micro-GEMM: launch overhead >> FLOPs; unpadded weight, fuseable by XLA.
        y = jnp.dot(x, w, preferred_element_type=jnp.float32) + b
        return _apply_act(y, act).astype(jnp.bfloat16)

    # M tiling: sublane-align (multiple of 8); only split into 256-row tiles
    # when there is enough work per tile (>= _SPLIT_MACS) so both v7x
    # TensorCores get a "parallel" extent >= 2.
    if M > 256 and macs >= _SPLIT_MACS:
        TM = 256
        M_pad = _round_up(M, TM)
    else:
        M_pad = _round_up(M, 8)
        TM = M_pad
    xp = jnp.pad(x, ((0, M_pad - M), (0, 0))) if M_pad != M else x

    # N tiling: split into 256-wide tiles only when N is large and the call
    # carries real work; never zero-pad a <=128-wide layer up (dispatch/HBM
    # bound, padding would just double store traffic).
    if N >= 512 and N % 256 == 0 and macs >= _SPLIT_MACS:
        TN = 256
    else:
        TN = N

    # TODO(synk): if K ever grows past a few thousand, add a K reduction grid
    # axis ("arbitrary") with an f32 VMEM scratch accumulator instead of
    # raising vmem_limit_bytes (v7x has 64 MiB physical / 32 MiB scoped VMEM).
    cost = pl.CostEstimate(
        flops=2 * M_pad * K * N,
        transcendentals=0,
        bytes_accessed=(M_pad * K + K * N + M_pad * N) * 2 + N * 4,
    )

    out = pl.pallas_call(
        functools.partial(_mm_bias_act_kernel, act=act),
        out_shape=jax.ShapeDtypeStruct((M_pad, N), jnp.bfloat16),
        grid=(M_pad // TM, N // TN),
        in_specs=[
            pl.BlockSpec((TM, K), lambda m, n: (m, 0)),
            pl.BlockSpec((K, TN), lambda m, n: (0, n)),
            pl.BlockSpec((1, TN), lambda m, n: (0, n)),
        ],
        out_specs=pl.BlockSpec((TM, TN), lambda m, n: (m, n)),
        compiler_params=pltpu.CompilerParams(
            dimension_semantics=("parallel", "parallel")),
        cost_estimate=cost,
    )(xp, w, b)

    return out[:M] if M_pad != M else out


# ---------------------------------------------------------------------------
# Conv2d (NHWC) = im2col (cheap channel concat) + matmul with fused epilogue
# ---------------------------------------------------------------------------
def conv2d(x, p, *, kh, kw, stride, padding, act="none"):
    """x: (N, H, W, C) NHWC bf16; p: {'w': (kh*kw*C, Cout) bf16, 'b': (1, Cout) f32}."""
    N, H, W, C = x.shape
    s, pd = stride, padding
    Ho = (H + 2 * pd - kh) // s + 1
    Wo = (W + 2 * pd - kw) // s + 1
    cout = p["w"].shape[1]
    xp = jnp.pad(x, ((0, 0), (pd, pd), (pd, pd), (0, 0))) if pd > 0 else x

    # TODO(synk): for large 3x3 decoder convs at production spatial sizes, do
    # the im2col gather inside the kernel (kh*kw "arbitrary" grid axis + pl.ds
    # shifted windows + VMEM f32 accumulator) instead of materializing the
    # kh*kw-wide patch matrix in HBM; at the current sizes the concat below is
    # negligible.
    cols = [xp[:, i:i + s * Ho:s, j:j + s * Wo:s, :]
            for i in range(kh) for j in range(kw)]
    patches = cols[0] if len(cols) == 1 else jnp.concatenate(cols, axis=-1)
    patches = patches.reshape(N * Ho * Wo, kh * kw * C)   # already bf16, no recast

    y = matmul_bias_act(patches, p["w"], p["b"], act=act)
    return y.reshape(N, Ho, Wo, cout)


# ---------------------------------------------------------------------------
# Plain-JAX glue ops (NHWC, bf16)
# ---------------------------------------------------------------------------
def maxpool2(x):
    N, H, W, C = x.shape
    Ho, Wo = H // 2, W // 2
    return x[:, :Ho * 2, :Wo * 2, :].reshape(N, Ho, 2, Wo, 2, C).max(axis=(2, 4))


def _adaptive_pool_matrix(out_size, in_size):
    A = np.zeros((out_size, in_size), np.float32)
    for i in range(out_size):
        s = (i * in_size) // out_size
        e = -(-((i + 1) * in_size) // out_size)  # ceil
        A[i, s:e] = 1.0 / (e - s)
    return jnp.asarray(A)


def adaptive_avg_pool(x, out_hw):
    Ho, Wo = out_hw
    _, H, W, _ = x.shape
    Ah = _adaptive_pool_matrix(Ho, H).astype(x.dtype)
    Aw = _adaptive_pool_matrix(Wo, W).astype(x.dtype)
    return jnp.einsum("hH,nHWc,wW->nhwc", Ah, x, Aw)


def _bilinear_matrix(out_size, in_size):
    """Interpolation matrix matching F.upsample(mode='bilinear', align_corners=False)."""
    i = np.arange(out_size, dtype=np.float64)
    src = (i + 0.5) * (in_size / out_size) - 0.5
    src = np.clip(src, 0.0, in_size - 1)
    i0 = np.floor(src).astype(np.int64)
    i1 = np.minimum(i0 + 1, in_size - 1)
    f = (src - i0).astype(np.float32)
    A = np.zeros((out_size, in_size), np.float32)
    A[np.arange(out_size), i0] += 1.0 - f
    A[np.arange(out_size), i1] += f
    return jnp.asarray(A)


def upsample_add(x, y):
    """Bilinear-resize x to y's spatial size (two small matmuls) and add y."""
    _, Hy, Wy, _ = y.shape
    _, Hx, Wx, _ = x.shape
    Rh = _bilinear_matrix(Hy, Hx).astype(x.dtype)
    Rw = _bilinear_matrix(Wy, Wx).astype(x.dtype)
    return jnp.einsum("hH,nHWc,wW->nhwc", Rh, x, Rw) + y


def pixel_shuffle(x, r):
    N, H, W, C = x.shape
    Co = C // (r * r)
    x = x.reshape(N, H, W, Co, r, r)
    x = x.transpose(0, 1, 4, 2, 5, 3)          # (N, H, r, W, r, Co)
    return x.reshape(N, H * r, W * r, Co)


# ---------------------------------------------------------------------------
# Parameters: deterministic init with PyTorch Conv2d shapes, laid out once as
# unpadded (kh*kw*Cin, Cout) bf16 weights + (1, Cout) f32 biases.
# Static hyper-params (kh/kw/stride/padding) are NOT stored here (arrays only).
# ---------------------------------------------------------------------------
def init_params(key):
    def conv_params(k, cout, cin, kh, kw):
        k1, k2 = jax.random.split(k)
        bound = 1.0 / np.sqrt(cin * kh * kw)
        w = jax.random.uniform(k1, (cout, cin, kh, kw), jnp.float32, -bound, bound)
        b = jax.random.uniform(k2, (cout,), jnp.float32, -bound, bound)
        # (Cout, Cin, kh, kw) -> (kh, kw, Cin, Cout) -> (kh*kw*Cin, Cout)
        w2 = jnp.transpose(w, (2, 3, 1, 0)).reshape(kh * kw * cin, cout)
        return {"w": w2.astype(jnp.bfloat16),
                "b": b.reshape(1, cout).astype(jnp.float32)}

    keys = jax.random.split(key, 13)
    p = {}
    p["down1a"] = conv_params(keys[0], 32, 2, 2, 2)        # downblock(2, 32)
    p["down1b"] = conv_params(keys[1], 32, 32, 2, 2)
    p["down2a"] = conv_params(keys[2], 64, 32, 2, 2)       # downblock(32, 64)
    p["down2b"] = conv_params(keys[3], 64, 64, 2, 2)
    p["down3a"] = conv_params(keys[4], 128, 64, 2, 2)      # downblock(64, 128)
    p["down3b"] = conv_params(keys[5], 128, 128, 2, 2)
    p["rc1"] = conv_params(keys[6], 128, RESNET_C, 2, 2)   # resnet_compressor
    p["rc2"] = conv_params(keys[7], 32, 128, 2, 2)
    p["pw"] = conv_params(keys[8], 64, 512 + 128 + 6 + 32, 1, 1)
    p["up1"] = conv_params(keys[9], 128 * 4, 64, 3, 3)     # upshuffle(64,128,2)
    p["up2"] = conv_params(keys[10], 64 * 4, 128, 3, 3)    # upshuffle(128,64,2)
    p["up3"] = conv_params(keys[11], 32 * 4, 64, 3, 3)     # upshuffle(64,32,2)
    p["up5"] = conv_params(keys[12], 1 * 4, 32, 2, 2)      # upshufflenorelu(32,1,2)
    return p


# ---------------------------------------------------------------------------
# Forward pass (MappingPredictorUNet.forward), internal NHWC bf16 layout
# ---------------------------------------------------------------------------
def mapping_predictor_unet_forward(params, observations, memory,
                                   prev_actions_embeds, clip_embedding):
    # ---- adapt_input ----
    resnet = clip_embedding
    base_map = observations[MAP_UUID].astype(jnp.float32)
    if resnet.ndim == 6:
        use_agent = True
        nstep, nsampler, nagent = resnet.shape[:3]
    else:
        use_agent = False
        nstep, nsampler = resnet.shape[:2]
        nagent = 1
    bm = base_map.reshape(-1, *base_map.shape[-3:])
    if base_map.shape[1] != 4:
        bm_nhwc = bm                                   # already channels-last
    else:
        bm_nhwc = bm.transpose(0, 2, 3, 1)             # NCHW -> NHWC
    bm_nhwc = bm_nhwc.astype(jnp.bfloat16)

    # ---- encoder ----
    walls_and_floor = bm_nhwc[..., 0:2]
    x = conv2d(walls_and_floor, params["down1a"], kh=2, kw=2, stride=2, padding=1, act="relu")
    x = conv2d(x, params["down1b"], kh=2, kw=2, stride=2, padding=1, act="relu")
    conv1 = adaptive_avg_pool(x, (40, 40))             # downsizeenforce
    x = maxpool2(conv1)
    x = conv2d(x, params["down2a"], kh=2, kw=2, stride=2, padding=1, act="relu")
    conv2 = conv2d(x, params["down2b"], kh=2, kw=2, stride=2, padding=1, act="relu")
    x = maxpool2(conv2)
    x = conv2d(x, params["down3a"], kh=2, kw=2, stride=2, padding=1, act="relu")
    conv3 = conv2d(x, params["down3b"], kh=2, kw=2, stride=2, padding=1, act="relu")
    x = maxpool2(conv3)

    # ---- compress_resnet (Dropout p=0.2 is identity in eval mode) ----
    r = observations[RESNET_UUID].astype(jnp.bfloat16).transpose(0, 2, 3, 1)
    r = conv2d(r, params["rc1"], kh=2, kw=2, stride=2, padding=0, act="relu")
    clip_compressed = conv2d(r, params["rc2"], kh=2, kw=2, stride=2, padding=0, act="relu")

    # ---- pointwise fuse (Dropout p=0 identity) ----
    mem = memory.reshape(-1, 1, 1, 512).astype(jnp.bfloat16)
    pae = prev_actions_embeds.reshape(-1, 1, 1, 6).astype(jnp.bfloat16)
    x = jnp.concatenate([x, clip_compressed, mem, pae], axis=-1)   # 128+32+512+6
    x = conv2d(x, params["pw"], kh=1, kw=1, stride=1, padding=0, act="leaky_relu")

    # ---- decoder (LeakyReLU commutes with PixelShuffle -> fused in the conv
    #      epilogue) ----
    x = conv2d(x, params["up1"], kh=3, kw=3, stride=1, padding=1, act="leaky_relu")
    x = upsample_add(pixel_shuffle(x, 2), conv3)
    x = conv2d(x, params["up2"], kh=3, kw=3, stride=1, padding=1, act="leaky_relu")
    x = upsample_add(pixel_shuffle(x, 2), conv2)
    x = conv2d(x, params["up3"], kh=3, kw=3, stride=1, padding=1, act="leaky_relu")
    x = upsample_add(pixel_shuffle(x, 2), conv1)
    x = conv2d(x, params["up5"], kh=2, kw=2, stride=2, padding=0, act="none")  # no relu
    x = pixel_shuffle(x, 2)                            # (N, Ho, Wo, 1)

    # ---- adapt_output ----
    Ho, Wo = x.shape[1], x.shape[2]
    x = x[..., 0].astype(jnp.float32)
    if use_agent:
        return x.reshape(nstep, nsampler, nagent, Ho, Wo)
    return x.reshape(nstep, nsampler * nagent, Ho, Wo)


# ---------------------------------------------------------------------------
if __name__ == "__main__":
    nstep, nsampler = 2, 1
    N = nstep * nsampler
    H_MAP = W_MAP = 16

    key = jax.random.PRNGKey(0)
    k_params, k_map, k_res, k_mem, k_act = jax.random.split(key, 5)
    params = init_params(k_params)

    observations = {
        # aggregate map sensor already in (N, 4, H, W) => no permute branch
        MAP_UUID: jax.random.uniform(k_map, (N, 4, H_MAP, W_MAP), jnp.float32),
        # resnet/clip features: 4x4 spatial so the compressor reaches 1x1
        RESNET_UUID: jax.random.normal(k_res, (N, RESNET_C, 4, 4), jnp.float32),
    }
    # clip_embedding only drives (nstep, nsampler) bookkeeping in adapt_input
    clip_embedding = observations[RESNET_UUID].reshape(nstep, nsampler, RESNET_C, 4, 4)
    memory = jax.random.normal(k_mem, (N, 512), jnp.float32)
    prev_actions_embeds = jax.random.normal(k_act, (N, 6), jnp.float32)

    fwd = jax.jit(mapping_predictor_unet_forward)
    out = fwd(params, observations, memory, prev_actions_embeds, clip_embedding)
    out = jax.block_until_ready(out)

    assert out.shape == (nstep, nsampler, 40, 40), out.shape
    assert jnp.all(jnp.isfinite(out))
    print("KERNEL_OK")
</pallas_src>

<mosaic_0001>
module attributes {stable_mosaic.version = 11 : i64} {
  func.func @_mm_bias_act_kernel(%arg0: i32, %arg1: i32, %arg2: memref<248x128xbf16, #tpu.memory_space<vmem>>, %arg3: memref<128x64xbf16, #tpu.memory_space<vmem>>, %arg4: memref<1x64xf32, #tpu.memory_space<vmem>>, %arg5: memref<248x64xbf16, #tpu.memory_space<vmem>>) attributes {dimension_semantics = [#tpu.dimension_semantics<parallel>, #tpu.dimension_semantics<parallel>], iteration_bounds = array<i64: 1, 1>, scalar_prefetch = 0 : i64, scratch_operands = 0 : i64, tpu.core_type = #tpu.core_type<tc>, window_params = [{transform_indices = @transform_0, window_bounds = array<i64: 248, 128>}, {transform_indices = @transform_1, window_bounds = array<i64: 128, 64>}, {transform_indices = @transform_2, window_bounds = array<i64: 1, 64>}, {transform_indices = @transform_3, window_bounds = array<i64: 248, 64>}]} {
    %c0 = arith.constant 0 : index
    %c0_0 = arith.constant 0 : index
    %0 = vector.load %arg2[%c0, %c0_0] : memref<248x128xbf16, #tpu.memory_space<vmem>>, vector<248x128xbf16>
    %c0_1 = arith.constant 0 : index
    %c0_2 = arith.constant 0 : index
    %1 = vector.load %arg3[%c0_1, %c0_2] : memref<128x64xbf16, #tpu.memory_space<vmem>>, vector<128x64xbf16>
    %cst = arith.constant dense<0.000000e+00> : vector<248x64xf32>
    %2 = tpu.matmul %0, %1, %cst {dimension_numbers = #tpu.dot_dimension_numbers<[1], [0], [0], [1], [0, 0, 1, 1], [], []>} : vector<248x128xbf16>, vector<128x64xbf16>, vector<248x64xf32> -> vector<248x64xf32>
    %c0_3 = arith.constant 0 : index
    %c0_4 = arith.constant 0 : index
    %3 = vector.load %arg4[%c0_3, %c0_4] : memref<1x64xf32, #tpu.memory_space<vmem>>, vector<1x64xf32>
    %4 = vector.broadcast %3 : vector<1x64xf32> to vector<248x64xf32>
    %5 = arith.addf %2, %4 : vector<248x64xf32>
    %cst_5 = arith.constant 0.000000e+00 : f32
    %6 = vector.broadcast %cst_5 : f32 to vector<248x64xf32>
    %7 = arith.maximumf %5, %6 : vector<248x64xf32>
    %8 = arith.truncf %7 : vector<248x64xf32> to vector<248x64xbf16>
    %c0_6 = arith.constant 0 : index
    %c0_7 = arith.constant 0 : index
    %9 = vector.load %arg5[%c0_6, %c0_7] : memref<248x64xbf16, #tpu.memory_space<vmem>>, vector<248x64xbf16>
    tpu.vector_store %arg5[%c0_6, %c0_7], %8 {strides = array<i32>} : memref<248x64xbf16, #tpu.memory_space<vmem>>, vector<248x64xbf16>,
    return
  }
  func.func @transform_0(%arg0: i32, %arg1: i32) -> (i32, i32) {
    %c0_i32 = arith.constant 0 : i32
    %c0_i32_0 = arith.constant 0 : i32
    return %arg0, %c0_i32 : i32, i32
  }
  func.func @transform_1(%arg0: i32, %arg1: i32) -> (i32, i32) {
    %c0_i32 = arith.constant 0 : i32
    %c0_i32_0 = arith.constant 0 : i32
    return %c0_i32, %arg1 : i32, i32
  }
  func.func @transform_2(%arg0: i32, %arg1: i32) -> (i32, i32) {
    %c0_i32 = arith.constant 0 : i32
    %c0_i32_0 = arith.constant 0 : i32
    return %c0_i32, %arg1 : i32, i32
  }
  func.func @transform_3(%arg0: i32, %arg1: i32) -> (i32, i32) {
    %c0_i32 = arith.constant 0 : i32
    return %arg0, %arg1 : i32, i32
  }
}

module attributes {stable_mosaic.version = 11 : i64} {
  func.func @_mm_bias_act_kernel(%arg0: i32, %arg1: i32, %arg2: memref<72x256xbf16, #tpu.memory_space<vmem>>, %arg3: memref<256x64xbf16, #tpu.memory_space<vmem>>, %arg4: memref<1x64xf32, #tpu.memory_space<vmem>>, %arg5: memref<72x64xbf16, #tpu.memory_space<vmem>>) attributes {dimension_semantics = [#tpu.dimension_semantics<parallel>, #tpu.dimension_semantics<parallel>], iteration_bounds = array<i64: 1, 1>, scalar_prefetch = 0 : i64, scratch_operands = 0 : i64, tpu.core_type = #tpu.core_type<tc>, window_params = [{transform_indices = @transform_0, window_bounds = array<i64: 72, 256>}, {transform_indices = @transform_1, window_bounds = array<i64: 256, 64>}, {transform_indices = @transform_2, window_bounds = array<i64: 1, 64>}, {transform_indices = @transform_3, window_bounds = array<i64: 72, 64>}]} {
    %c0 = arith.constant 0 : index
    %c0_0 = arith.constant 0 : index
    %0 = vector.load %arg2[%c0, %c0_0] : memref<72x256xbf16, #tpu.memory_space<vmem>>, vector<72x256xbf16>
    %c0_1 = arith.constant 0 : index
    %c0_2 = arith.constant 0 : index
    %1 = vector.load %arg3[%c0_1, %c0_2] : memref<256x64xbf16, #tpu.memory_space<vmem>>, vector<256x64xbf16>
    %cst = arith.constant dense<0.000000e+00> : vector<72x64xf32>
    %2 = tpu.matmul %0, %1, %cst {dimension_numbers = #tpu.dot_dimension_numbers<[1], [0], [0], [1], [0, 0, 1, 1], [], []>} : vector<72x256xbf16>, vector<256x64xbf16>, vector<72x64xf32> -> vector<72x64xf32>
    %c0_3 = arith.constant 0 : index
    %c0_4 = arith.constant 0 : index
    %3 = vector.load %arg4[%c0_3, %c0_4] : memref<1x64xf32, #tpu.memory_space<vmem>>, vector<1x64xf32>
    %4 = vector.broadcast %3 : vector<1x64xf32> to vector<72x64xf32>
    %5 = arith.addf %2, %4 : vector<72x64xf32>
    %cst_5 = arith.constant 0.000000e+00 : f32
    %6 = vector.broadcast %cst_5 : f32 to vector<72x64xf32>
    %7 = arith.maximumf %5, %6 : vector<72x64xf32>
    %8 = arith.truncf %7 : vector<72x64xf32> to vector<72x64xbf16>
    %c0_6 = arith.constant 0 : index
    %c0_7 = arith.constant 0 : index
    %9 = vector.load %arg5[%c0_6, %c0_7] : memref<72x64xbf16, #tpu.memory_space<vmem>>, vector<72x64xbf16>
    tpu.vector_store %arg5[%c0_6, %c0_7], %8 {strides = array<i32>} : memref<72x64xbf16, #tpu.memory_space<vmem>>, vector<72x64xbf16>,
    return
  }
  func.func @transform_0(%arg0: i32, %arg1: i32) -> (i32, i32) {
    %c0_i32 = arith.constant 0 : i32
    %c0_i32_0 = arith.constant 0 : i32
    return %arg0, %c0_i32 : i32, i32
  }
  func.func @transform_1(%arg0: i32, %arg1: i32) -> (i32, i32) {
    %c0_i32 = arith.constant 0 : i32
    %c0_i32_0 = arith.constant 0 : i32
    return %c0_i32, %arg1 : i32, i32
  }
  func.func @transform_2(%arg0: i32, %arg1: i32) -> (i32, i32) {
    %c0_i32 = arith.constant 0 : i32
    %c0_i32_0 = arith.constant 0 : i32
    return %c0_i32, %arg1 : i32, i32
  }
  func.func @transform_3(%arg0: i32, %arg1: i32) -> (i32, i32) {
    %c0_i32 = arith.constant 0 : i32
    return %arg0, %arg1 : i32, i32
  }
}

module attributes {stable_mosaic.version = 11 : i64} {
  func.func @_mm_bias_act_kernel(%arg0: i32, %arg1: i32, %arg2: memref<72x576xbf16, #tpu.memory_space<vmem>>, %arg3: memref<576x128xbf16, #tpu.memory_space<vmem>>, %arg4: memref<1x128xf32, #tpu.memory_space<vmem>>, %arg5: memref<72x128xbf16, #tpu.memory_space<vmem>>) attributes {dimension_semantics = [#tpu.dimension_semantics<parallel>, #tpu.dimension_semantics<parallel>], iteration_bounds = array<i64: 1, 1>, scalar_prefetch = 0 : i64, scratch_operands = 0 : i64, tpu.core_type = #tpu.core_type<tc>, window_params = [{transform_indices = @transform_0, window_bounds = array<i64: 72, 576>}, {transform_indices = @transform_1, window_bounds = array<i64: 576, 128>}, {transform_indices = @transform_2, window_bounds = array<i64: 1, 128>}, {transform_indices = @transform_3, window_bounds = array<i64: 72, 128>}]} {
    %c0 = arith.constant 0 : index
    %c0_0 = arith.constant 0 : index
    %0 = vector.load %arg2[%c0, %c0_0] : memref<72x576xbf16, #tpu.memory_space<vmem>>, vector<72x576xbf16>
    %c0_1 = arith.constant 0 : index
    %c0_2 = arith.constant 0 : index
    %1 = vector.load %arg3[%c0_1, %c0_2] : memref<576x128xbf16, #tpu.memory_space<vmem>>, vector<576x128xbf16>
    %cst = arith.constant dense<0.000000e+00> : vector<72x128xf32>
    %2 = tpu.matmul %0, %1, %cst {dimension_numbers = #tpu.dot_dimension_numbers<[1], [0], [0], [1], [0, 0, 1, 1], [], []>} : vector<72x576xbf16>, vector<576x128xbf16>, vector<72x128xf32> -> vector<72x128xf32>
    %c0_3 = arith.constant 0 : index
    %c0_4 = arith.constant 0 : index
    %3 = vector.load %arg4[%c0_3, %c0_4] : memref<1x128xf32, #tpu.memory_space<vmem>>, vector<1x128xf32>
    %4 = vector.broadcast %3 : vector<1x128xf32> to vector<72x128xf32>
    %5 = arith.addf %2, %4 : vector<72x128xf32>
    %cst_5 = arith.constant 0.000000e+00 : f32
    %6 = vector.broadcast %cst_5 : f32 to vector<72x128xf32>
    %7 = arith.cmpf oge, %5, %6 : vector<72x128xf32>
    %cst_6 = arith.constant 0.00999999977 : f32
    %8 = vector.broadcast %cst_6 : f32 to vector<72x128xf32>
    %9 = arith.mulf %8, %5 : vector<72x128xf32>
    %10 = arith.select %7, %5, %9 : vector<72x128xi1>, vector<72x128xf32>
    %11 = arith.truncf %10 : vector<72x128xf32> to vector<72x128xbf16>
    %c0_7 = arith.constant 0 : index
    %c0_8 = arith.constant 0 : index
    %12 = vector.load %arg5[%c0_7, %c0_8] : memref<72x128xbf16, #tpu.memory_space<vmem>>, vector<72x128xbf16>
    tpu.vector_store %arg5[%c0_7, %c0_8], %11 {strides = array<i32>} : memref<72x128xbf16, #tpu.memory_space<vmem>>, vector<72x128xbf16>,
    return
  }
  func.func @transform_0(%arg0: i32, %arg1: i32) -> (i32, i32) {
    %c0_i32 = arith.constant 0 : i32
    %c0_i32_0 = arith.constant 0 : i32
    return %arg0, %c0_i32 : i32, i32
  }
  func.func @transform_1(%arg0: i32, %arg1: i32) -> (i32, i32) {
    %c0_i32 = arith.constant 0 : i32
    %c0_i32_0 = arith.constant 0 : i32
    return %c0_i32, %arg1 : i32, i32
  }
  func.func @transform_2(%arg0: i32, %arg1: i32) -> (i32, i32) {
    %c0_i32 = arith.constant 0 : i32
    %c0_i32_0 = arith.constant 0 : i32
    return %c0_i32, %arg1 : i32, i32
  }
  func.func @transform_3(%arg0: i32, %arg1: i32) -> (i32, i32) {
    %c0_i32 = arith.constant 0 : i32
    return %arg0, %arg1 : i32, i32
  }
}

</mosaic_0001>

<bundles_post_ra>
// kernel: mapping_predictor_unet_forward.3
= control target key start
LH: loop header
LB: loop body
LE: loop exit
PB: predicated region body
PF: predicated region fallthrough
CT: control target
= control target key end

     0   :  { %vm527_vm0 = vcmask 519168   ;;  %s1014_s1 = inlined_call_operand.vmem [shape: bf16[128,64], index: 1, kind: input, shape index: {}]   ;;  %s1015_s0 = inlined_call_operand.vmem [shape: bf16[248,128], index: 0, kind: input, shape index: {}]   ;;  %s1016_s2 = inlined_call_operand.vmem [shape: f32[1,64], index: 2, kind: input, shape index: {}]   ;;  %s1017_s3 = inlined_call_operand.vmem [shape: bf16[248,64], index: 3, kind: output, shape index: {}]  }
   0x1   :  { %v738_v0 = vld [vmem:[%s1014_s1 + $0x38] sm:$0xff]   ;;  %v739_v1 = vld [vmem:[%s1014_s1 + $0x30] sm:$0xff]   ;;  %v740_v2 = vld [vmem:[%s1014_s1 + $0x28] sm:$0xff]  }
   0x2   :  { %674 = vmatprep.subr.bf16.mxu0 %v738_v0  ;;  %722 = vmatprep.subr.bf16.mxu1 %v738_v0  ;;  %v741_v3 = vld [vmem:[%s1014_s1 + $0x20] sm:$0xff]   ;;  %v742_v6 = vld [vmem:[%s1014_s1 + $0x18] sm:$0xff]   ;;  %v743_v7 = vld [vmem:[%s1014_s1 + $0x10] sm:$0xff]  }
   0x3   :  { %675 = vmatpush3.bf16.msra.mxu0 %v738_v0  ;;  %730 = vmatpush3.bf16.msra.mxu1 %v738_v0  ;;  %v746_v4 = vld [vmem:[%s1015_s0] sm:$0xff]   ;;  %v744_v8 = vld [vmem:[%s1014_s1 + $0x8] sm:$0xff]   ;;  %v750_v12 = vld [vmem:[%s1015_s0 + $0x10] sm:$0xff]  }
   0x4   :  { %676 = vmatprep.subr.bf16.mxu0 %v739_v1  ;;  %723 = vmatprep.subr.bf16.mxu1 %v739_v1  ;;  %v747_v5 = vld [vmem:[%s1015_s0 + $0x40] sm:$0xff]   ;;  %v748_v10 = vld [vmem:[%s1015_s0 + $0x8] sm:$0xff]   ;;  %v751_v13 = vld [vmem:[%s1015_s0 + $0x50] sm:$0xff]  }
   0x5   :  { %690 = vmatprep.mubr.bf16.mxu0 %v746_v4  ;;  %706 = vmatprep.mubr.bf16.mxu1 %v747_v5  ;;  %v745_v9 = vld [vmem:[%s1014_s1] sm:$0xff]   ;;  %v749_v11 = vld [vmem:[%s1015_s0 + $0x48] sm:$0xff]   ;;  %v752_v14 = vld [vmem:[%s1015_s0 + $0x18] sm:$0xff]  }
   0x6   :  { %v753_v15 = vld [vmem:[%s1015_s0 + $0x58] sm:$0xff]   ;;  %v754_v16 = vld [vmem:[%s1015_s0 + $0x20] sm:$0xff]   ;;  %v756_v18 = vld [vmem:[%s1015_s0 + $0x28] sm:$0xff]  }
   0x7   :  { %677 = vmatpush3.bf16.msra.mxu0 %v739_v1  ;;  %731 = vmatpush3.bf16.msra.mxu1 %v739_v1  ;;  %v755_v17 = vld [vmem:[%s1015_s0 + $0x60] sm:$0xff]   ;;  %v757_v19 = vld [vmem:[%s1015_s0 + $0x68] sm:$0xff]   ;;  %v758_v20 = vld [vmem:[%s1015_s0 + $0x30] sm:$0xff]  }
   0x8   :  { %678 = vmatprep.subr.bf16.mxu0 %v740_v2  ;;  %724 = vmatprep.subr.bf16.mxu1 %v740_v2  ;;  %v759_v21 = vld [vmem:[%s1015_s0 + $0x70] sm:$0xff]   ;;  %v760_v22 = vld [vmem:[%s1015_s0 + $0x38] sm:$0xff]   ;;  %v857_v24 = vld [vmem:[%s1016_s2] ss:$0 sm:$0xff] }
   0x9   :  { %v761_v23 = vld [vmem:[%s1015_s0 + $0x78] ss:$0 sps:$4 sm:$0xff]  }
   0xb   :  { %679 = vmatpush3.bf16.msra.mxu0 %v740_v2  ;;  %732 = vmatpush3.bf16.msra.mxu1 %v740_v2 }
   0xc   :  { %680 = vmatprep.subr.bf16.mxu0 %v741_v3  ;;  %725 = vmatprep.subr.bf16.mxu1 %v741_v3 }
   0xf   :  { %681 = vmatpush3.bf16.msra.mxu0 %v741_v3  ;;  %733 = vmatpush3.bf16.msra.mxu1 %v741_v3 }
  0x10   :  { %682 = vmatprep.subr.bf16.mxu0 %v742_v6  ;;  %726 = vmatprep.subr.bf16.mxu1 %v742_v6 }
  0x13   :  { %683 = vmatpush3.bf16.msra.mxu0 %v742_v6  ;;  %734 = vmatpush3.bf16.msra.mxu1 %v742_v6 }
  0x14   :  { %684 = vmatprep.subr.bf16.mxu0 %v743_v7  ;;  %727 = vmatprep.subr.bf16.mxu1 %v743_v7 }
  0x17   :  { %685 = vmatpush3.bf16.msra.mxu0 %v743_v7  ;;  %735 = vmatpush3.bf16.msra.mxu1 %v743_v7 }
  0x18   :  { %686 = vmatprep.subr.bf16.mxu0 %v744_v8  ;;  %728 = vmatprep.subr.bf16.mxu1 %v744_v8 }
  0x1b   :  { %687 = vmatpush3.bf16.msra.mxu0 %v744_v8  ;;  %736 = vmatpush3.bf16.msra.mxu1 %v744_v8 }
  0x1c   :  { %688 = vmatprep.subr.bf16.mxu0 %v745_v9  ;;  %729 = vmatprep.subr.bf16.mxu1 %v745_v9 }
  0x1f   :  { %689 = vmatpush3.bf16.msra.mxu0 %v745_v9  ;;  %737 = vmatpush3.bf16.msra.mxu1 %v745_v9 }
  0x22   :  { %691 = vmatmul.mubr.bf16.vlgmr.msra.gmra.mxu0 %v748_v10  ;;  %707 = vmatmul.mubr.bf16.vlgmr.msra.gmra.mxu1 %v749_v11 }
  0x23   :  { %694 = vmatprep.mubr.bf16.mxu0 %v750_v12  ;;  %710 = vmatprep.mubr.bf16.mxu1 %v751_v13 }
  0x2a   :  { %695 = vmatmul.mubr.bf16.gmra.mxu0 %v752_v14  ;;  %711 = vmatmul.mubr.bf16.gmra.mxu1 %v753_v15 }
  0x2b   :  { %698 = vmatprep.mubr.bf16.mxu0 %v754_v16  ;;  %714 = vmatprep.mubr.bf16.mxu1 %v755_v17 }
  0x32   :  { %699 = vmatmul.mubr.bf16.gmra.mxu0 %v756_v18  ;;  %715 = vmatmul.mubr.bf16.gmra.mxu1 %v757_v19 }
  0x33   :  { %702 = vmatprep.mubr.bf16.mxu0 %v758_v20  ;;  %718 = vmatprep.mubr.bf16.mxu1 %v759_v21 }
  0x3a   :  { %703 = vmatmul.mubr.bf16.gmra.mxu0 %v760_v22  ;;  %719 = vmatmul.mubr.bf16.gmra.mxu1 %v761_v23 }
  0xe2   :  { %v692_v25 = vpop.f32.mrf.mxu0  ;;  %v708_v26 = vpop.f32.mrf.mxu1 }
  0xe3   :  { %v254_v27 = vadd.f32 %v692_v25, %v857_v24  ;;  %v318_v28 = vadd.f32 %v708_v26, %v857_v24 }
  0xe4   :  { %v245_v29 = vpop.f32.mrf.mxu0  ;;  %v309_v30 = vpop.f32.mrf.mxu1 }
  0xe5   :  { %v373_v31 = vmax.f32 %v254_v27, 0.0  ;;  %v389_v32 = vmax.f32 %v318_v28, 0.0  ;;  %v246_v33 = vadd.f32 %v857_v24, %v245_v29  ;;  %v310_v34 = vadd.f32 %v857_v24, %v309_v30 }
  0xe6   :  { %v693_v35 = vpop.f32.mrf.mxu0  ;;  %v709_v36 = vpop.f32.mrf.mxu1 }
  0xe7   :  { %v621_v37 = vpack.c.bf16 %v373_v31, %v373_v31  ;;  %v637_v38 = vpack.c.bf16 %v389_v32, %v389_v32  ;;  %v371_v39 = vmax.f32 %v246_v33, 0.0  ;;  %v387_v40 = vmax.f32 %v310_v34, 0.0 }
  0xe8   :  { %v257_v41 = vadd.f32 %v693_v35, %v857_v24  ;;  %v321_v42 = vadd.f32 %v709_v36, %v857_v24  ;;  %v248_v43 = vpop.f32.mrf.mxu0  ;;  %v312_v44 = vpop.f32.mrf.mxu1 }
  0xe9   :  { %530 = vst.msk [vmem:[%s1017_s3 + $0x8] sm:$0xf] %vm527_vm0, %v621_v37  ;;  %546 = vst.msk [vmem:[%s1017_s3 + $0x48] sm:$0xf] %vm527_vm0, %v637_v38  ;;  %v619_v45 = vpack.c.bf16 %v371_v39, %v371_v39  ;;  %v635_v46 = vpack.c.bf16 %v387_v40, %v387_v40  ;;  %v249_v47 = vadd.f32 %v857_v24, %v248_v43 }
  0xea   :  { %v313_v48 = vadd.f32 %v857_v24, %v312_v44  ;;  %v374_v49 = vmax.f32 %v257_v41, 0.0  ;;  %v390_v50 = vmax.f32 %v321_v42, 0.0  ;;  %v696_v51 = vpop.f32.mrf.mxu0  ;;  %v712_v52 = vpop.f32.mrf.mxu1 }
  0xeb   :  { %528 = vst.msk [vmem:[%s1017_s3] sm:$0xf] %vm527_vm0, %v619_v45  ;;  %544 = vst.msk [vmem:[%s1017_s3 + $0x40] sm:$0xf] %vm527_vm0, %v635_v46  ;;  %v372_v53 = vmax.f32 %v249_v47, 0.0  ;;  %v270_v55 = vadd.f32 %v696_v51, %v857_v24  ;;  %v334_v56 = vadd.f32 %v712_v52, %v857_v24 }
  0xec   :  { %v388_v54 = vmax.f32 %v313_v48, 0.0  ;;  %v622_v57 = vpack.c.bf16 %v374_v49, %v374_v49  ;;  %v638_v58 = vpack.c.bf16 %v390_v50, %v390_v50  ;;  %v261_v59 = vpop.f32.mrf.mxu0  ;;  %v325_v60 = vpop.f32.mrf.mxu1 }
  0xed   :  { %v620_v61 = vpack.c.bf16 %v372_v53, %v372_v53  ;;  %v377_v63 = vmax.f32 %v270_v55, 0.0  ;;  %v393_v0 = vmax.f32 %v334_v56, 0.0  ;;  %v262_v1 = vadd.f32 %v857_v24, %v261_v59 }
  0xee   :  { %v636_v62 = vpack.c.bf16 %v388_v54, %v388_v54  ;;  %531 = vst.msk [vmem:[%s1017_s3 + $0xc] sm:$0xf] %vm527_vm0, %v622_v57  ;;  %547 = vst.msk [vmem:[%s1017_s3 + $0x4c] sm:$0xf] %vm527_vm0, %v638_v58  ;;  %v326_v2 = vadd.f32 %v857_v24, %v325_v60  ;;  %v697_v3 = vpop.f32.mrf.mxu0  ;;  %v713_v4 = vpop.f32.mrf.mxu1 }
  0xef   :  { %529 = vst.msk [vmem:[%s1017_s3 + $0x4] sm:$0xf] %vm527_vm0, %v620_v61  ;;  %v625_v5 = vpack.c.bf16 %v377_v63, %v377_v63  ;;  %v641_v6 = vpack.c.bf16 %v393_v0, %v393_v0  ;;  %v273_v7 = vadd.f32 %v697_v3, %v857_v24  ;;  %v337_v8 = vadd.f32 %v713_v4, %v857_v24 }
  0xf0   :  { %545 = vst.msk [vmem:[%s1017_s3 + $0x44] sm:$0xf] %vm527_vm0, %v636_v62  ;;  %v375_v9 = vmax.f32 %v262_v1, 0.0  ;;  %v391_v10 = vmax.f32 %v326_v2, 0.0  ;;  %v264_v11 = vpop.f32.mrf.mxu0  ;;  %v328_v12 = vpop.f32.mrf.mxu1 }
  0xf1   :  { %534 = vst.msk [vmem:[%s1017_s3 + $0x18] sm:$0xf] %vm527_vm0, %v625_v5  ;;  %550 = vst.msk [vmem:[%s1017_s3 + $0x58] sm:$0xf] %vm527_vm0, %v641_v6  ;;  %v378_v13 = vmax.f32 %v273_v7, 0.0  ;;  %v394_v14 = vmax.f32 %v337_v8, 0.0  ;;  %v265_v15 = vadd.f32 %v857_v24, %v264_v11  ;;  %v329_v16 = vadd.f32 %v857_v24, %v328_v12 }
  0xf2   :  { %v623_v17 = vpack.c.bf16 %v375_v9, %v375_v9  ;;  %v639_v18 = vpack.c.bf16 %v391_v10, %v391_v10  ;;  %v700_v19 = vpop.f32.mrf.mxu0  ;;  %v716_v20 = vpop.f32.mrf.mxu1 }
  0xf3   :  { %v626_v21 = vpack.c.bf16 %v378_v13, %v378_v13  ;;  %v642_v22 = vpack.c.bf16 %v394_v14, %v394_v14  ;;  %v376_v23 = vmax.f32 %v265_v15, 0.0  ;;  %v392_v25 = vmax.f32 %v329_v16, 0.0 }
  0xf4   :  { %532 = vst.msk [vmem:[%s1017_s3 + $0x10] sm:$0xf] %vm527_vm0, %v623_v17  ;;  %548 = vst.msk [vmem:[%s1017_s3 + $0x50] sm:$0xf] %vm527_vm0, %v639_v18  ;;  %v286_v26 = vadd.f32 %v700_v19, %v857_v24  ;;  %v350_v27 = vadd.f32 %v716_v20, %v857_v24  ;;  %v277_v28 = vpop.f32.mrf.mxu0  ;;  %v341_v29 = vpop.f32.mrf.mxu1 }
  0xf5   :  { %535 = vst.msk [vmem:[%s1017_s3 + $0x1c] sm:$0xf] %vm527_vm0, %v626_v21  ;;  %551 = vst.msk [vmem:[%s1017_s3 + $0x5c] sm:$0xf] %vm527_vm0, %v642_v22  ;;  %v624_v30 = vpack.c.bf16 %v376_v23, %v376_v23  ;;  %v640_v31 = vpack.c.bf16 %v392_v25, %v392_v25  ;;  %v278_v32 = vadd.f32 %v857_v24, %v277_v28 }
  0xf6   :  { %v342_v33 = vadd.f32 %v857_v24, %v341_v29  ;;  %v381_v34 = vmax.f32 %v286_v26, 0.0  ;;  %v397_v35 = vmax.f32 %v350_v27, 0.0  ;;  %v701_v36 = vpop.f32.mrf.mxu0  ;;  %v717_v37 = vpop.f32.mrf.mxu1 }
  0xf7   :  { %533 = vst.msk [vmem:[%s1017_s3 + $0x14] sm:$0xf] %vm527_vm0, %v624_v30  ;;  %549 = vst.msk [vmem:[%s1017_s3 + $0x54] sm:$0xf] %vm527_vm0, %v640_v31  ;;  %v379_v38 = vmax.f32 %v278_v32, 0.0  ;;  %v289_v40 = vadd.f32 %v701_v36, %v857_v24  ;;  %v353_v41 = vadd.f32 %v717_v37, %v857_v24 }
  0xf8   :  { %v395_v39 = vmax.f32 %v342_v33, 0.0  ;;  %v629_v42 = vpack.c.bf16 %v381_v34, %v381_v34  ;;  %v645_v43 = vpack.c.bf16 %v397_v35, %v397_v35  ;;  %v280_v44 = vpop.f32.mrf.mxu0  ;;  %v344_v45 = vpop.f32.mrf.mxu1 }
  0xf9   :  { %v627_v46 = vpack.c.bf16 %v379_v38, %v379_v38  ;;  %v382_v48 = vmax.f32 %v289_v40, 0.0  ;;  %v398_v49 = vmax.f32 %v353_v41, 0.0  ;;  %v281_v50 = vadd.f32 %v857_v24, %v280_v44 }
  0xfa   :  { %v643_v47 = vpack.c.bf16 %v395_v39, %v395_v39  ;;  %538 = vst.msk [vmem:[%s1017_s3 + $0x28] sm:$0xf] %vm527_vm0, %v629_v42  ;;  %554 = vst.msk [vmem:[%s1017_s3 + $0x68] sm:$0xf] %vm527_vm0, %v645_v43  ;;  %v345_v51 = vadd.f32 %v857_v24, %v344_v45  ;;  %v704_v52 = vpop.f32.mrf.mxu0  ;;  %v720_v53 = vpop.f32.mrf.mxu1 }
  0xfb   :  { %536 = vst.msk [vmem:[%s1017_s3 + $0x20] sm:$0xf] %vm527_vm0, %v627_v46  ;;  %v630_v54 = vpack.c.bf16 %v382_v48, %v382_v48  ;;  %v646_v55 = vpack.c.bf16 %v398_v49, %v398_v49  ;;  %v302_v56 = vadd.f32 %v704_v52, %v857_v24  ;;  %v366_v57 = vadd.f32 %v720_v53, %v857_v24 }
  0xfc   :  { %552 = vst.msk [vmem:[%s1017_s3 + $0x60] sm:$0xf] %vm527_vm0, %v643_v47  ;;  %v380_v58 = vmax.f32 %v281_v50, 0.0  ;;  %v396_v59 = vmax.f32 %v345_v51, 0.0  ;;  %v293_v60 = vpop.f32.mrf.mxu0  ;;  %v357_v61 = vpop.f32.mrf.mxu1 }
  0xfd   :  { %539 = vst.msk [vmem:[%s1017_s3 + $0x2c] sm:$0xf] %vm527_vm0, %v630_v54  ;;  %555 = vst.msk [vmem:[%s1017_s3 + $0x6c] sm:$0xf] %vm527_vm0, %v646_v55  ;;  %v385_v62 = vmax.f32 %v302_v56, 0.0  ;;  %v401_v63 = vmax.f32 %v366_v57, 0.0  ;;  %v294_v0 = vadd.f32 %v857_v24, %v293_v60  ;;  %v358_v1 = vadd.f32 %v857_v24, %v357_v61 }
  0xfe   :  { %v628_v2 = vpack.c.bf16 %v380_v58, %v380_v58  ;;  %v644_v3 = vpack.c.bf16 %v396_v59, %v396_v59  ;;  %v705_v4 = vpop.f32.mrf.mxu0  ;;  %v721_v5 = vpop.f32.mrf.mxu1 }
  0xff   :  { %v633_v6 = vpack.c.bf16 %v385_v62, %v385_v62  ;;  %v649_v7 = vpack.c.bf16 %v401_v63, %v401_v63  ;;  %v383_v8 = vmax.f32 %v294_v0, 0.0  ;;  %v399_v9 = vmax.f32 %v358_v1, 0.0 }
 0x100   :  { %537 = vst.msk [vmem:[%s1017_s3 + $0x24] sm:$0xf] %vm527_vm0, %v628_v2  ;;  %553 = vst.msk [vmem:[%s1017_s3 + $0x64] sm:$0xf] %vm527_vm0, %v644_v3  ;;  %v305_v10 = vadd.f32 %v705_v4, %v857_v24  ;;  %v296_v11 = vpop.f32.mrf.mxu0  ;;  %v360_v12 = vpop.f32.mrf.mxu1 }
 0x101   :  { %542 = vst.msk [vmem:[%s1017_s3 + $0x38] sm:$0xf] %vm527_vm0, %v633_v6  ;;  %558 = vst.msk [vmem:[%s1017_s3 + $0x78] sm:$0xf] %vm527_vm0, %v649_v7  ;;  %v631_v13 = vpack.c.bf16 %v383_v8, %v383_v8  ;;  %v647_v14 = vpack.c.bf16 %v399_v9, %v399_v9  ;;  %v297_v15 = vadd.f32 %v857_v24, %v296_v11 }
 0x102   :  { %v361_v16 = vadd.f32 %v857_v24, %v360_v12  ;;  %v386_v17 = vmax.f32 %v305_v10, 0.0 }
 0x103   :  { %540 = vst.msk [vmem:[%s1017_s3 + $0x30] sm:$0xf] %vm527_vm0, %v631_v13  ;;  %556 = vst.msk [vmem:[%s1017_s3 + $0x70] sm:$0xf] %vm527_vm0, %v647_v14  ;;  %v384_v18 = vmax.f32 %v297_v15, 0.0 }
 0x104   :  { %v400_v19 = vmax.f32 %v361_v16, 0.0  ;;  %v634_v20 = vpack.c.bf16 %v386_v17, %v386_v17 }
 0x105   :  { %v632_v21 = vpack.c.bf16 %v384_v18, %v384_v18 }
 0x106   :  { %v648_v22 = vpack.c.bf16 %v400_v19, %v400_v19  ;;  %543 = vst.msk [vmem:[%s1017_s3 + $0x3c] sm:$0xf] %vm527_vm0, %v634_v20 }
 0x107   :  { %541 = vst.msk [vmem:[%s1017_s3 + $0x34] sm:$0xf] %vm527_vm0, %v632_v21 }
 0x108   :  { %557 = vst.msk [vmem:[%s1017_s3 + $0x74] sm:$0xf] %vm527_vm0, %v648_v22 }

// kernel: mapping_predictor_unet_forward.4
= control target key start
LH: loop header
LB: loop body
LE: loop exit
PB: predicated region body
PF: predicated region fallthrough
CT: control target
= control target key end

     0   :  { %vm324_vm0 = vcmask 519168   ;;  %s609_s1 = inlined_call_operand.vmem [shape: bf16[256,64], index: 1, kind: input, shape index: {}]   ;;  %s610_s0 = inlined_call_operand.vmem [shape: bf16[72,256], index: 0, kind: input, shape index: {}]   ;;  %s611_s2 = inlined_call_operand.vmem [shape: f32[1,64], index: 2, kind: input, shape index: {}]   ;;  %s612_s3 = inlined_call_operand.vmem [shape: bf16[72,64], index: 3, kind: output, shape index: {}]  }
   0x1   :  { %v445_v0 = vld [vmem:[%s609_s1 + $0x78] sm:$0xff]   ;;  %v447_v2 = vld [vmem:[%s609_s1 + $0x70] sm:$0xff]   ;;  %v449_v4 = vld [vmem:[%s609_s1 + $0x68] sm:$0xff]  }
   0x2   :  { %v446_v1 = vld [vmem:[%s609_s1 + $0x38] sm:$0xff]   ;;  %383 = vmatprep.subr.bf16.mxu0 %v445_v0  ;;  %429 = vmatprep.subr.bf16.mxu1 %v445_v0  ;;  %v448_v3 = vld [vmem:[%s609_s1 + $0x30] sm:$0xff]   ;;  %v450_v5 = vld [vmem:[%s609_s1 + $0x28] sm:$0xff]  }
   0x3   :  { %384 = vmatpush3.bf16.msra.mxu0 %v446_v1  ;;  %437 = vmatpush3.bf16.msra.mxu1 %v446_v1  ;;  %v451_v6 = vld [vmem:[%s609_s1 + $0x60] sm:$0xff]   ;;  %v453_v8 = vld [vmem:[%s609_s1 + $0x58] sm:$0xff]   ;;  %v455_v10 = vld [vmem:[%s609_s1 + $0x50] sm:$0xff]  }
   0x4   :  { %385 = vmatprep.subr.bf16.mxu0 %v447_v2  ;;  %430 = vmatprep.subr.bf16.mxu1 %v447_v2  ;;  %v452_v7 = vld [vmem:[%s609_s1 + $0x20] sm:$0xff]   ;;  %v454_v9 = vld [vmem:[%s609_s1 + $0x18] sm:$0xff]   ;;  %v456_v13 = vld [vmem:[%s609_s1 + $0x10] sm:$0xff]  }
   0x5   :  { %v463_v11 = vld [vmem:[%s610_s0 + $0x4] ss:$8 sps:$4 sm:$0xff]   ;;  %v466_v12 = vld [vmem:[%s610_s0 + $0x34] ss:$8 sps:$4 sm:$0xff]   ;;  %v461_v19 = vld [vmem:[%s610_s0] ss:$8 sps:$4 sm:$0xff]  }
   0x6   :  { %v457_v14 = vld [vmem:[%s609_s1 + $0x48] sm:$0xff]   ;;  %238 = vmatprep.mubr.bf16.mxu0 %v463_v11  ;;  %262 = vmatprep.mubr.bf16.mxu1 %v466_v12  ;;  %v459_v16 = vld [vmem:[%s609_s1 + $0x40] sm:$0xff]   ;;  %v464_v20 = vld [vmem:[%s610_s0 + $0x30] ss:$8 sps:$4 sm:$0xff]  }
   0x7   :  { %386 = vmatpush3.bf16.msra.mxu0 %v448_v3  ;;  %438 = vmatpush3.bf16.msra.mxu1 %v448_v3  ;;  %v458_v15 = vld [vmem:[%s609_s1 + $0x8] sm:$0xff]   ;;  %v460_v17 = vld [vmem:[%s609_s1] sm:$0xff]   ;;  %v467_v21 = vld [vmem:[%s610_s0 + $0x14] ss:$8 sps:$4 sm:$0xff]  }
   0x8   :  { %387 = vmatprep.subr.bf16.mxu0 %v449_v4  ;;  %431 = vmatprep.subr.bf16.mxu1 %v449_v4  ;;  %v23_v18 = vld [vmem:[%s610_s0 + $0x40] sm:$0xff]  ;;  %v469_v23 = vld [vmem:[%s610_s0 + $0x10] ss:$8 sps:$4 sm:$0xff]  }
   0x9   :  { %v348_v22 = vcombine.high %v23_v18, %v23_v18  ;;  %v347_v24 = vcombine.low %v23_v18, %v23_v18  ;;  %v472_v25 = vld [vmem:[%s610_s0 + $0x24] ss:$8 sps:$4 sm:$0xff]   ;;  %v474_v26 = vld [vmem:[%s610_s0 + $0x20] ss:$8 sps:$4 sm:$0xff]  }
   0xa   :  { %v338_v29 = vld [vmem:[%s611_s2] ss:$0 sm:$0xff] }
   0xb   :  { %388 = vmatpush3.bf16.msra.mxu0 %v450_v5  ;;  %439 = vmatpush3.bf16.msra.mxu1 %v450_v5 }
   0xc   :  { %389 = vmatprep.subr.bf16.mxu0 %v451_v6  ;;  %432 = vmatprep.subr.bf16.mxu1 %v451_v6 }
   0xf   :  { %390 = vmatpush3.bf16.msra.mxu0 %v452_v7  ;;  %440 = vmatpush3.bf16.msra.mxu1 %v452_v7 }
  0x10   :  { %391 = vmatprep.subr.bf16.mxu0 %v453_v8  ;;  %433 = vmatprep.subr.bf16.mxu1 %v453_v8 }
  0x13   :  { %392 = vmatpush3.bf16.msra.mxu0 %v454_v9  ;;  %441 = vmatpush3.bf16.msra.mxu1 %v454_v9 }
  0x14   :  { %393 = vmatprep.subr.bf16.mxu0 %v455_v10  ;;  %434 = vmatprep.subr.bf16.mxu1 %v455_v10 }
  0x17   :  { %394 = vmatpush3.bf16.msra.mxu0 %v456_v13  ;;  %442 = vmatpush3.bf16.msra.mxu1 %v456_v13 }
  0x18   :  { %395 = vmatprep.subr.bf16.mxu0 %v457_v14  ;;  %435 = vmatprep.subr.bf16.mxu1 %v457_v14 }
  0x1b   :  { %396 = vmatpush3.bf16.msra.mxu0 %v458_v15  ;;  %443 = vmatpush3.bf16.msra.mxu1 %v458_v15 }
  0x1c   :  { %397 = vmatprep.subr.bf16.mxu0 %v459_v16  ;;  %436 = vmatprep.subr.bf16.mxu1 %v459_v16 }
  0x1f   :  { %398 = vmatpush3.bf16.msra.mxu0 %v460_v17  ;;  %444 = vmatpush3.bf16.msra.mxu1 %v460_v17 }
  0x22   :  { %239 = vmatmul.mubr.bf16.vlgmr.msra.gmra.mxu0 %v461_v19  ;;  %263 = vmatmul.mubr.bf16.vlgmr.msra.gmra.mxu1 %v464_v20 }
  0x23   :  { %246 = vmatprep.mubr.bf16.mxu0 %v467_v21  ;;  %270 = vmatprep.mubr.bf16.mxu1 %v348_v22 }
  0x2a   :  { %247 = vmatmul.mubr.bf16.gmra.mxu0 %v469_v23  ;;  %271 = vmatmul.mubr.bf16.gmra.mxu1 %v347_v24 }
  0x2b   :  { %254 = vmatprep.mubr.bf16.mxu0 %v472_v25 }
  0x32   :  { %255 = vmatmul.mubr.bf16.gmra.mxu0 %v474_v26 }
  0xe2   :  { %v399_v27 = vpop.f32.mrf.mxu0  ;;  %v417_v28 = vpop.f32.mrf.mxu1 }
  0xe4   :  { %v400_v30 = vpop.f32.mrf.mxu0  ;;  %v418_v31 = vpop.f32.mrf.mxu1 }
  0xe5   :  { %v401_v32 = vadd.f32 %v400_v30, %v399_v27  ;;  %v419_v33 = vadd.f32 %v418_v31, %v417_v28 }
  0xe6   :  { %v402_v34 = vpop.f32.mrf.mxu0  ;;  %v420_v35 = vpop.f32.mrf.mxu1 }
  0xe7   :  { %v241_v36 = vadd.f32 %v401_v32, %v338_v29  ;;  %v265_v37 = vadd.f32 %v419_v33, %v338_v29 }
  0xe8   :  { %v403_v38 = vpop.f32.mrf.mxu0  ;;  %v421_v39 = vpop.f32.mrf.mxu1 }
  0xe9   :  { %v278_v40 = vmax.f32 %v241_v36, 0.0  ;;  %v404_v41 = vadd.f32 %v403_v38, %v402_v34  ;;  %v284_v42 = vmax.f32 %v265_v37, 0.0  ;;  %v422_v43 = vadd.f32 %v421_v39, %v420_v35 }
  0xea   :  { %v405_v44 = vpop.f32.mrf.mxu0  ;;  %v423_v45 = vpop.f32.mrf.mxu1 }
  0xeb   :  { %v374_v46 = vpack.c.bf16 %v278_v40, %v278_v40  ;;  %v244_v47 = vadd.f32 %v404_v41, %v338_v29  ;;  %v380_v48 = vpack.c.bf16 %v284_v42, %v284_v42  ;;  %v268_v49 = vadd.f32 %v422_v43, %v338_v29 }
  0xec   :  { %v406_v50 = vpop.f32.mrf.mxu0  ;;  %v424_v51 = vpop.f32.mrf.mxu1 }
  0xed   :  { %325 = vst.msk [vmem:[%s612_s3] sm:$0xf] %vm324_vm0, %v374_v46  ;;  %v279_v52 = vmax.f32 %v244_v47, 0.0  ;;  %331 = vst.msk [vmem:[%s612_s3 + $0x18] sm:$0xf] %vm324_vm0, %v380_v48  ;;  %v407_v53 = vadd.f32 %v406_v50, %v405_v44  ;;  %v285_v54 = vmax.f32 %v268_v49, 0.0  ;;  %v425_v55 = vadd.f32 %v424_v51, %v423_v45 }
  0xee   :  { %v408_v56 = vpop.f32.mrf.mxu0  ;;  %v426_v57 = vpop.f32.mrf.mxu1 }
  0xef   :  { %v375_v58 = vpack.c.bf16 %v279_v52, %v279_v52  ;;  %v249_v59 = vadd.f32 %v407_v53, %v338_v29  ;;  %v381_v60 = vpack.c.bf16 %v285_v54, %v285_v54  ;;  %v273_v61 = vadd.f32 %v425_v55, %v338_v29 }
  0xf0   :  { %v409_v62 = vpop.f32.mrf.mxu0  ;;  %v427_v63 = vpop.f32.mrf.mxu1 }
  0xf1   :  { %326 = vst.msk [vmem:[%s612_s3 + $0x4] sm:$0xf] %vm324_vm0, %v375_v58  ;;  %v280_v0 = vmax.f32 %v249_v59, 0.0  ;;  %332 = vst.msk [vmem:[%s612_s3 + $0x1c] sm:$0xf] %vm324_vm0, %v381_v60  ;;  %v410_v1 = vadd.f32 %v409_v62, %v408_v56  ;;  %v286_v2 = vmax.f32 %v273_v61, 0.0 }
  0xf2   :  { %v411_v3 = vpop.f32.mrf.mxu0 }
  0xf3   :  { %v376_v4 = vpack.c.bf16 %v280_v0, %v280_v0  ;;  %v252_v5 = vadd.f32 %v410_v1, %v338_v29  ;;  %v382_v6 = vpack.c.bf16 %v286_v2, %v286_v2 }
  0xf4   :  { %v412_v7 = vpop.f32.mrf.mxu0 }
  0xf5   :  { %327 = vst.msk [vmem:[%s612_s3 + $0x8] sm:$0xf] %vm324_vm0, %v376_v4  ;;  %v281_v8 = vmax.f32 %v252_v5, 0.0  ;;  %333 = vst.msk [vmem:[%s612_s3 + $0x20] sm:$0xf] %vm324_vm0, %v382_v6  ;;  %v413_v9 = vadd.f32 %v412_v7, %v411_v3 }
  0xf6   :  { %v414_v10 = vpop.f32.mrf.mxu0 }
  0xf7   :  { %v377_v11 = vpack.c.bf16 %v281_v8, %v281_v8  ;;  %v257_v12 = vadd.f32 %v413_v9, %v338_v29 }
  0xf8   :  { %v415_v13 = vpop.f32.mrf.mxu0 }
  0xf9   :  { %328 = vst.msk [vmem:[%s612_s3 + $0xc] sm:$0xf] %vm324_vm0, %v377_v11  ;;  %v282_v14 = vmax.f32 %v257_v12, 0.0  ;;  %v416_v15 = vadd.f32 %v415_v13, %v414_v10 }
  0xfb   :  { %v378_v16 = vpack.c.bf16 %v282_v14, %v282_v14  ;;  %v260_v17 = vadd.f32 %v416_v15, %v338_v29 }
  0xfd   :  { %329 = vst.msk [vmem:[%s612_s3 + $0x10] sm:$0xf] %vm324_vm0, %v378_v16  ;;  %v283_v18 = vmax.f32 %v260_v17, 0.0 }
  0xff   :  { %v379_v19 = vpack.c.bf16 %v283_v18, %v283_v18 }
 0x101   :  { %330 = vst.msk [vmem:[%s612_s3 + $0x14] sm:$0xf] %vm324_vm0, %v379_v19 }

// kernel: mapping_predictor_unet_forward.5
= control target key start
LH: loop header
LB: loop body
LE: loop exit
PB: predicated region body
PF: predicated region fallthrough
CT: control target
= control target key end

     0   :  { %v1079_v34 = vmov 0.0   ;;  %vm1080_vm0 = vmmov 0   ;;  %vm454_vm1 = vcmask 523264   ;;  %s1341_s1 = inlined_call_operand.vmem [shape: bf16[576,128], index: 1, kind: input, shape index: {}]   ;;  %s1342_s0 = inlined_call_operand.vmem [shape: bf16[72,576], index: 0, kind: input, shape index: {}]   ;;  %s1343_s2 = inlined_call_operand.vmem [shape: f32[1,128], index: 2, kind: input, shape index: {}]   ;;  %s1344_s3 = inlined_call_operand.vmem [shape: bf16[72,128], index: 3, kind: output, shape index: {}]  }
   0x1   :  { %v1010_v0 = vld [vmem:[%s1341_s1 + $0x78] sm:$0xff]   ;;  %v1014_v4 = vld [vmem:[%s1341_s1 + $0x70] sm:$0xff]   ;;  %v1018_v8 = vld [vmem:[%s1341_s1 + $0x68] sm:$0xff]  }
   0x2   :  { %v1011_v1 = vld [vmem:[%s1341_s1 + $0xf8] sm:$0xff]   ;;  %871 = vmatprep.subr.bf16.mxu0 %v1010_v0  ;;  %v1015_v5 = vld [vmem:[%s1341_s1 + $0xf0] sm:$0xff]   ;;  %v1019_v9 = vld [vmem:[%s1341_s1 + $0xe8] sm:$0xff]  }
   0x3   :  { %v1012_v2 = vld [vmem:[%s1341_s1 + $0x38] sm:$0xff]   ;;  %917 = vmatprep.subr.bf16.mxu1 %v1011_v1  ;;  %v1016_v6 = vld [vmem:[%s1341_s1 + $0x30] sm:$0xff]   ;;  %v1020_v10 = vld [vmem:[%s1341_s1 + $0x28] sm:$0xff]  }
   0x4   :  { %v1013_v3 = vld [vmem:[%s1341_s1 + $0xb8] sm:$0xff]   ;;  %872 = vmatpush3.bf16.msra.mxu0 %v1012_v2  ;;  %v1017_v7 = vld [vmem:[%s1341_s1 + $0xb0] sm:$0xff]   ;;  %v1021_v11 = vld [vmem:[%s1341_s1 + $0xa8] sm:$0xff]  }
   0x5   :  { %918 = vmatpush3.bf16.msra.mxu1 %v1013_v3  ;;  %873 = vmatprep.subr.bf16.mxu0 %v1014_v4  ;;  %v1022_v12 = vld [vmem:[%s1341_s1 + $0x60] sm:$0xff]   ;;  %v1026_v16 = vld [vmem:[%s1341_s1 + $0x58] sm:$0xff]   ;;  %v1030_v20 = vld [vmem:[%s1341_s1 + $0x50] sm:$0xff]  }
   0x6   :  { %919 = vmatprep.subr.bf16.mxu1 %v1015_v5  ;;  %v1023_v13 = vld [vmem:[%s1341_s1 + $0xe0] sm:$0xff]   ;;  %v1027_v17 = vld [vmem:[%s1341_s1 + $0xd8] sm:$0xff]   ;;  %v1031_v21 = vld [vmem:[%s1341_s1 + $0xd0] sm:$0xff]  }
   0x7   :  { %v1024_v14 = vld [vmem:[%s1341_s1 + $0x20] sm:$0xff]   ;;  %v1028_v18 = vld [vmem:[%s1341_s1 + $0x18] sm:$0xff]   ;;  %v1032_v22 = vld [vmem:[%s1341_s1 + $0x10] sm:$0xff]  }
   0x8   :  { %874 = vmatpush3.bf16.msra.mxu0 %v1016_v6  ;;  %v1025_v15 = vld [vmem:[%s1341_s1 + $0xa0] sm:$0xff]   ;;  %v1029_v19 = vld [vmem:[%s1341_s1 + $0x98] sm:$0xff]   ;;  %v1033_v23 = vld [vmem:[%s1341_s1 + $0x90] sm:$0xff]  }
   0x9   :  { %920 = vmatpush3.bf16.msra.mxu1 %v1017_v7  ;;  %875 = vmatprep.subr.bf16.mxu0 %v1018_v8  ;;  %v1034_v24 = vld [vmem:[%s1341_s1 + $0x48] sm:$0xff]   ;;  %v1038_v28 = vld [vmem:[%s1341_s1 + $0x40] sm:$0xff]   ;;  %v1048_v37 = vld [vmem:[%s1341_s1 + $0x118] sm:$0xff]  }
   0xa   :  { %921 = vmatprep.subr.bf16.mxu1 %v1019_v9  ;;  %v1035_v25 = vld [vmem:[%s1341_s1 + $0xc8] sm:$0xff]   ;;  %v1039_v29 = vld [vmem:[%s1341_s1 + $0xc0] sm:$0xff]   ;;  %v1055_v40 = vld [vmem:[%s1341_s1 + $0x110] sm:$0xff]  }
   0xb   :  { %v1036_v26 = vld [vmem:[%s1341_s1 + $0x8] sm:$0xff]   ;;  %v1040_v30 = vld [vmem:[%s1341_s1] sm:$0xff]   ;;  %v1058_v44 = vld [vmem:[%s1342_s0 + $0x5c] ss:$20 sps:$4 sm:$0xff]  }
   0xc   :  { %876 = vmatpush3.bf16.msra.mxu0 %v1020_v10  ;;  %v1037_v27 = vld [vmem:[%s1341_s1 + $0x88] sm:$0xff]   ;;  %v1041_v31 = vld [vmem:[%s1341_s1 + $0x80] sm:$0xff]   ;;  %v1063_v49 = vld [vmem:[%s1342_s0 + $0x7c] ss:$20 sps:$4 sm:$0xff]  }
   0xd   :  { %922 = vmatpush3.bf16.msra.mxu1 %v1021_v11  ;;  %877 = vmatprep.subr.bf16.mxu0 %v1022_v12  ;;  %v1042_v32 = vld [vmem:[%s1342_s0] ss:$20 sps:$4 sm:$0xff]   ;;  %v1044_v33 = vld [vmem:[%s1342_s0 + $0x4] ss:$20 sps:$4 sm:$0xff]   ;;  %v1045_v35 = vld [vmem:[%s1342_s0 + $0x8] ss:$20 sps:$4 sm:$0xff]  }
   0xe   :  { %923 = vmatprep.subr.bf16.mxu1 %v1023_v13  ;;  %v1047_v36 = vld [vmem:[%s1342_s0 + $0xc] ss:$20 sps:$4 sm:$0xff]   ;;  %502 = vmatprep.mubr.bf16.mxu0 %v1044_v33  ;;  %v1051_v39 = vld [vmem:[%s1342_s0 + $0x34] ss:$20 sps:$4 sm:$0xff]   ;;  %v1054_v42 = vld [vmem:[%s1342_s0 + $0x30] ss:$20 sps:$4 sm:$0xff]  }
   0xf   :  { %574 = vmatprep.mubr.bf16.mxu1 %v1047_v36  ;;  %v1049_v38 = vld [vmem:[%s1342_s0 + $0x2c] ss:$20 sps:$4 sm:$0xff]   ;;  %v1053_v41 = vld [vmem:[%s1342_s0 + $0x28] ss:$20 sps:$4 sm:$0xff]   ;;  %v1060_v46 = vld [vmem:[%s1342_s0 + $0x50] ss:$20 sps:$4 sm:$0xff]  }
  0x10   :  { %878 = vmatpush3.bf16.msra.mxu0 %v1024_v14  ;;  %v1056_v43 = vld [vmem:[%s1342_s0 + $0x54] ss:$20 sps:$4 sm:$0xff]   ;;  %v1071_v47 = vld [vmem:[%s1341_s1 + $0x100] sm:$0xff]   ;;  %v1061_v48 = vld [vmem:[%s1342_s0 + $0x58] ss:$20 sps:$4 sm:$0xff]  }
  0x11   :  { %924 = vmatpush3.bf16.msra.mxu1 %v1025_v15  ;;  %879 = vmatprep.subr.bf16.mxu0 %v1026_v16  ;;  %v1062_v45 = vld [vmem:[%s1341_s1 + $0x108] sm:$0xff]   ;;  %v1065_v50 = vld [vmem:[%s1342_s0 + $0x84] ss:$20 sps:$4 sm:$0xff]   ;;  %v1068_v54 = vld [vmem:[%s1342_s0 + $0x80] ss:$20 sps:$4 sm:$0xff]  }
  0x12   :  { %925 = vmatprep.subr.bf16.mxu1 %v1027_v17  ;;  %v39_v51 = vld [vmem:[%s1342_s0 + $0xa0] sm:$0xff]  ;;  %v40_v52 = vld [vmem:[%s1342_s0 + $0xa8] sm:$0xff]  ;;  %v1077_v62 = vld [vmem:[%s1342_s0 + $0xb0] ss:$0 sps:$4 sm:$0xff]  }
  0x13   :  { %v1067_v53 = vld [vmem:[%s1342_s0 + $0x78] ss:$20 sps:$4 sm:$0xff]   ;;  %v785_v55 = vcombine.high %v39_v51, %v39_v51  ;;  %v787_v56 = vcombine.high %v40_v52, %v40_v52  ;;  %v784_v57 = vcombine.low %v39_v51, %v39_v51  ;;  %v786_v58 = vcombine.low %v40_v52, %v40_v52  ;;  %v1074_v59 = vld [vmem:[%s1342_s0 + $0x10] ss:$20 sps:$4 sm:$0xff]   ;;  %v1075_v60 = vld [vmem:[%s1342_s0 + $0x88] ss:$20 sps:$4 sm:$0xff]  }
  0x14   :  { %880 = vmatpush3.bf16.msra.mxu0 %v1028_v18  ;;  %v1076_v61 = vld [vmem:[%s1342_s0 + $0x38] ss:$20 sps:$4 sm:$0xff]   ;;  %v1078_v63 = vld [vmem:[%s1342_s0 + $0x60] ss:$20 sps:$4 sm:$0xff]  }
  0x15   :  { %926 = vmatpush3.bf16.msra.mxu1 %v1029_v19  ;;  %881 = vmatprep.subr.bf16.mxu0 %v1030_v20  ;;  %v1308_v33 = vld [vmem:[%s1343_s2] ss:$0 sm:$0xff] }
  0x16   :  { %927 = vmatprep.subr.bf16.mxu1 %v1031_v21 }
  0x18   :  { %882 = vmatpush3.bf16.msra.mxu0 %v1032_v22 }
  0x19   :  { %928 = vmatpush3.bf16.msra.mxu1 %v1033_v23  ;;  %883 = vmatprep.subr.bf16.mxu0 %v1034_v24 }
  0x1a   :  { %929 = vmatprep.subr.bf16.mxu1 %v1035_v25 }
  0x1c   :  { %884 = vmatpush3.bf16.msra.mxu0 %v1036_v26 }
  0x1d   :  { %930 = vmatpush3.bf16.msra.mxu1 %v1037_v27  ;;  %885 = vmatprep.subr.bf16.mxu0 %v1038_v28 }
  0x1e   :  { %931 = vmatprep.subr.bf16.mxu1 %v1039_v29 }
  0x20   :  { %886 = vmatpush3.bf16.msra.mxu0 %v1040_v30 }
  0x21   :  { %932 = vmatpush3.bf16.msra.mxu1 %v1041_v31  ;;  %972 = vmatprep.subr.bf16.mxu0 %v1079_v34 }
  0x22   :  { %1000 = vmatprep.subr.bf16.mxu1 %v1079_v34 }
  0x23   :  { %503 = vmatmul.mubr.bf16.vlgmr.msra.gmra.mxu0 %v1042_v32 }
  0x24   :  { %575 = vmatmul.mubr.bf16.vlgmr.msra.gmra.mxu1 %v1045_v35  ;;  %973 = vmatpush3.bf16.msra.mxu0 %v1048_v37 }
  0x25   :  { %510 = vmatprep.mubr.bf16.mxu0 %v1049_v38  ;;  %974 = vmatprep.subr.bf16.mxu0 %v1079_v34 }
  0x26   :  { %582 = vmatprep.mubr.bf16.mxu1 %v1051_v39  ;;  %1004 = vmatpush3.bf16.msra.mxu1 %v1048_v37 }
  0x27   :  { %1001 = vmatprep.subr.bf16.mxu1 %v1079_v34 }
  0x28   :  { %975 = vmatpush3.bf16.msra.mxu0 %v1055_v40 }
  0x29   :  { %976 = vmatprep.subr.bf16.mxu0 %v1079_v34 }
  0x2a   :  { %1005 = vmatpush3.bf16.msra.mxu1 %v1055_v40 }
  0x2b   :  { %511 = vmatmul.mubr.bf16.gmra.mxu0 %v1053_v41  ;;  %1002 = vmatprep.subr.bf16.mxu1 %v1079_v34 }
  0x2c   :  { %583 = vmatmul.mubr.bf16.gmra.mxu1 %v1054_v42  ;;  %518 = vmatprep.mubr.bf16.mxu0 %v1056_v43 }
  0x2d   :  { %590 = vmatprep.mubr.bf16.mxu1 %v1058_v44  ;;  %977 = vmatpush3.bf16.msra.mxu0 %v1062_v45 }
  0x2e   :  { %978 = vmatprep.subr.bf16.mxu0 %v1079_v34  ;;  %1006 = vmatpush3.bf16.msra.mxu1 %v1062_v45 }
  0x2f   :  { %1003 = vmatprep.subr.bf16.mxu1 %v1079_v34 }
  0x31   :  { %979 = vmatpush3.bf16.msra.mxu0 %v1071_v47 }
  0x32   :  { %1007 = vmatpush3.bf16.msra.mxu1 %v1071_v47 }
  0x33   :  { %519 = vmatmul.mubr.bf16.gmra.mxu0 %v1060_v46 }
  0x34   :  { %591 = vmatmul.mubr.bf16.gmra.mxu1 %v1061_v48  ;;  %526 = vmatprep.mubr.bf16.mxu0 %v1063_v49 }
  0x35   :  { %598 = vmatprep.mubr.bf16.mxu1 %v1065_v50 }
  0x3b   :  { %527 = vmatmul.mubr.bf16.gmra.mxu0 %v1067_v53 }
  0x3c   :  { %599 = vmatmul.mubr.bf16.gmra.mxu1 %v1068_v54  ;;  %534 = vmatprep.mubr.bf16.mxu0 %v785_v55 }
  0x3d   :  { %606 = vmatprep.mubr.bf16.mxu1 %v787_v56 }
  0x43   :  { %535 = vmatmul.mubr.bf16.gmra.mxu0 %v784_v57 }
  0x44   :  { %607 = vmatmul.mubr.bf16.gmra.mxu1 %v786_v58  ;;  %980 = vmatprep.mubr.msk.bf16.mxu0 %vm1080_vm0, %v1079_v34 }
  0x45   :  { %992 = vmatprep.mubr.msk.bf16.mxu1 %vm1080_vm0, %v1079_v34 }
  0x4b   :  { %981 = vmatmul.mubr.msk.bf16.vlgmr.msra.gmra.mxu0 %vm454_vm1, %v1074_v59 }
  0x4c   :  { %993 = vmatmul.mubr.msk.bf16.vlgmr.msra.gmra.mxu1 %vm454_vm1, %v1075_v60  ;;  %984 = vmatprep.mubr.msk.bf16.mxu0 %vm1080_vm0, %v1079_v34 }
  0x4d   :  { %996 = vmatprep.mubr.msk.bf16.mxu1 %vm1080_vm0, %v1079_v34 }
  0x53   :  { %985 = vmatmul.mubr.msk.bf16.gmra.mxu0 %vm454_vm1, %v1076_v61 }
  0x54   :  { %997 = vmatmul.mubr.msk.bf16.gmra.mxu1 %vm454_vm1, %v1077_v62  ;;  %988 = vmatprep.mubr.msk.bf16.mxu0 %vm1080_vm0, %v1079_v34 }
  0x5b   :  { %989 = vmatmul.mubr.msk.bf16.gmra.mxu0 %vm454_vm1, %v1078_v63 }
  0xe3   :  { %v887_v0 = vpop.f32.mrf.mxu0 }
  0xe4   :  { %v933_v1 = vpop.f32.mrf.mxu1 }
  0xe5   :  { %v888_v2 = vpop.f32.mrf.mxu0 }
  0xe6   :  { %v934_v3 = vpop.f32.mrf.mxu1  ;;  %v889_v31 = vadd.f32 %v888_v2, %v887_v0 }
  0xe7   :  { %v890_v4 = vpop.f32.mrf.mxu0  ;;  %v935_v39 = vadd.f32 %v934_v3, %v933_v1 }
  0xe8   :  { %v936_v5 = vpop.f32.mrf.mxu1  ;;  %v505_v38 = vadd.f32 %v889_v31, %v1308_v33 }
  0xe9   :  { %v891_v6 = vpop.f32.mrf.mxu0 }
  0xea   :  { %v937_v7 = vpop.f32.mrf.mxu1  ;;  %v892_v40 = vadd.f32 %v891_v6, %v890_v4  ;;  %v577_v52 = vadd.f32 %v935_v39, %v505_v38 }
  0xeb   :  { %v893_v8 = vpop.f32.mrf.mxu0  ;;  %v938_v50 = vadd.f32 %v937_v7, %v936_v5 }
  0xec   :  { %v939_v9 = vpop.f32.mrf.mxu1  ;;  %v508_v49 = vadd.f32 %v892_v40, %v1308_v33 }
  0xed   :  { %v894_v10 = vpop.f32.mrf.mxu0 }
  0xee   :  { %v940_v11 = vpop.f32.mrf.mxu1  ;;  %v895_v46 = vadd.f32 %v894_v10, %v893_v8  ;;  %v580_v2 = vadd.f32 %v938_v50, %v508_v49 }
  0xef   :  { %v896_v12 = vpop.f32.mrf.mxu0  ;;  %v941_v59 = vadd.f32 %v940_v11, %v939_v9 }
  0xf0   :  { %v1291_v13 = vpop.f32.mrf.mxu1  ;;  %v513_v58 = vadd.f32 %v895_v46, %v1308_v33 }
  0xf1   :  { %v897_v14 = vpop.f32.mrf.mxu0 }
  0xf2   :  { %v943_v15 = vpop.f32.mrf.mxu1  ;;  %v898_v0 = vadd.f32 %v897_v14, %v896_v12 }
  0xf3   :  { %v899_v16 = vpop.f32.mrf.mxu0 }
  0xf4   :  { %v1293_v17 = vpop.f32.mrf.mxu1  ;;  %v516_v12 = vadd.f32 %v898_v0, %v1308_v33 }
  0xf5   :  { %v900_v18 = vpop.f32.mrf.mxu0 }
  0xf6   :  { %v1295_v19 = vpop.f32.mrf.mxu1  ;;  %v901_v7 = vadd.f32 %v900_v18, %v899_v16 }
  0xf7   :  { %v1297_v20 = vpop.f32.mrf.mxu0 }
  0xf8   :  { %v1299_v21 = vpop.f32.mrf.mxu1  ;;  %v521_v31 = vadd.f32 %v901_v7, %v1308_v33 }
  0xf9   :  { %v1301_v22 = vpop.f32.mrf.mxu0 }
  0xfa   :  { %v1303_v23 = vpop.f32.mrf.mxu1  ;;  %v904_v40 = vadd.f32 %v1301_v22, %v1297_v20 }
  0xfb   :  { %v905_v24 = vpop.f32.mrf.mxu0  ;;  %v950_v20 = vadd.f32 %v1303_v23, %v1299_v21 }
  0xfc   :  { %v951_v25 = vpop.f32.mrf.mxu1  ;;  %v524_v49 = vadd.f32 %v904_v40, %v1308_v33 }
  0xfd   :  { %v906_v26 = vpop.f32.mrf.mxu0 }
  0xfe   :  { %v952_v27 = vpop.f32.mrf.mxu1  ;;  %v907_v34 = vadd.f32 %v906_v26, %v905_v24  ;;  %v944_v26 = vadd.f32 %v943_v15, %v1291_v13  ;;  %v596_v23 = vadd.f32 %v950_v20, %v524_v49 }
  0xff   :  { %v908_v28 = vpop.f32.mrf.mxu0  ;;  %v953_v43 = vadd.f32 %v952_v27, %v951_v25  ;;  %v585_v25 = vadd.f32 %v941_v59, %v513_v58 }
 0x100   :  { %v954_v29 = vpop.f32.mrf.mxu1  ;;  %v529_v42 = vadd.f32 %v907_v34, %v1308_v33 }
 0x101   :  { %v909_v30 = vpop.f32.mrf.mxu0 }
 0x102   :  { %v955_v32 = vpop.f32.mrf.mxu1  ;;  %v910_v44 = vadd.f32 %v909_v30, %v908_v28  ;;  %v601_v57 = vadd.f32 %v953_v43, %v529_v42 }
 0x103   :  { %v911_v35 = vpop.f32.mrf.mxu0  ;;  %v956_v54 = vadd.f32 %v955_v32, %v954_v29  ;;  %v947_v29 = vadd.f32 %v1295_v19, %v1293_v17  ;;  %v588_v17 = vadd.f32 %v944_v26, %v516_v12 }
 0x104   :  { %v957_v36 = vpop.f32.mrf.mxu1  ;;  %v532_v53 = vadd.f32 %v910_v44, %v1308_v33 }
 0x105   :  { %v912_v37 = vpop.f32.mrf.mxu0 }
 0x106   :  { %v958_v41 = vpop.f32.mrf.mxu1  ;;  %v913_v55 = vadd.f32 %v912_v37, %v911_v35  ;;  %v604_v6 = vadd.f32 %v956_v54, %v532_v53 }
 0x107   :  { %v914_v45 = vpop.f32.mrf.mxu0  ;;  %v959_v4 = vadd.f32 %v958_v41, %v957_v36 }
 0x108   :  { %v960_v47 = vpop.f32.mrf.mxu1  ;;  %v537_v3 = vadd.f32 %v913_v55, %v1308_v33 }
 0x109   :  { %v915_v48 = vpop.f32.mrf.mxu0 }
 0x10a   :  { %v961_v51 = vpop.f32.mrf.mxu1  ;;  %v609_v30 = vadd.f32 %v959_v4, %v537_v3  ;;  %v593_v48 = vadd.f32 %v947_v29, %v521_v31 }
 0x10b   :  { %v648_v56 = vpop.f32.mrf.mxu0 }
 0x10c   :  { %v649_v60 = vadd.f32 %v648_v56, %v577_v52  ;;  %v672_v61 = vpop.f32.mrf.mxu1 }
 0x10d   :  { %v673_v62 = vadd.f32 %v672_v61, %v601_v57  ;;  %v982_v63 = vpop.f32.mrf.mxu0 }
 0x10e   :  { %v994_v1 = vpop.f32.mrf.mxu1  ;;  %v695_v8 = vmul.f32 0.01, %v649_v60  ;;  %vm686_vm2 = vcmp.ge.f32.partialorder %v649_v60, 0.0 }
 0x10f   :  { %v651_v5 = vpop.f32.mrf.mxu0  ;;  %v701_v9 = vmul.f32 0.01, %v673_v62  ;;  %vm692_vm3 = vcmp.ge.f32.partialorder %v673_v62, 0.0 }
 0x110   :  { %v652_v10 = vadd.f32 %v651_v5, %v580_v2  ;;  %v675_v24 = vpop.f32.mrf.mxu1  ;;  %v704_v13 = vsel %vm686_vm2, %v649_v60, %v695_v8 }
 0x111   :  { %v676_v11 = vadd.f32 %v675_v24, %v604_v6  ;;  %v983_v27 = vpop.f32.mrf.mxu0  ;;  %v710_v35 = vsel %vm692_vm3, %v673_v62, %v701_v9 }
 0x112   :  { %vm687_vm4 = vcmp.ge.f32.partialorder %v652_v10, 0.0  ;;  %v696_v14 = vmul.f32 0.01, %v652_v10  ;;  %v995_v28 = vpop.f32.mrf.mxu1 }
 0x113   :  { %vm693_vm5 = vcmp.ge.f32.partialorder %v676_v11, 0.0  ;;  %v702_v16 = vmul.f32 0.01, %v676_v11  ;;  %v656_v18 = vpop.f32.mrf.mxu0 }
 0x114   :  { %v705_v15 = vsel %vm687_vm4, %v652_v10, %v696_v14  ;;  %v657_v32 = vadd.f32 %v656_v18, %v585_v25  ;;  %v680_v34 = vpop.f32.mrf.mxu1 }
 0x115   :  { %v851_v36 = vpack.c.bf16 %v705_v15, %v704_v13  ;;  %v711_v37 = vsel %vm693_vm5, %v676_v11, %v702_v16  ;;  %v681_v38 = vadd.f32 %v680_v34, %v609_v30  ;;  %v986_v39 = vpop.f32.mrf.mxu0 }
 0x116   :  { %v866_v41 = vpack.c.bf16 %v711_v37, %v710_v35  ;;  %v998_v19 = vpop.f32.mrf.mxu1  ;;  %v697_v44 = vmul.f32 0.01, %v657_v32  ;;  %vm688_vm7 = vcmp.ge.f32.partialorder %v657_v32, 0.0 }
 0x117   :  { %852 = vst [vmem:[%s1344_s3] sm:$0xff] %v851_v36   ;;  %vm694_vm6 = vcmp.ge.f32.partialorder %v681_v38, 0.0  ;;  %v703_v42 = vmul.f32 0.01, %v681_v38  ;;  %v659_v43 = vpop.f32.mrf.mxu0 }
 0x118   :  { %870 = vst [vmem:[%s1344_s3 + $0x18] sm:$0xff] %v866_v41   ;;  %v660_v45 = vadd.f32 %v659_v43, %v588_v17  ;;  %v683_v46 = vpop.f32.mrf.mxu1  ;;  %v706_v54 = vsel %vm688_vm7, %v657_v32, %v697_v44 }
 0x119   :  { %v712_v22 = vsel %vm694_vm6, %v681_v38, %v703_v42  ;;  %v987_v47 = vpop.f32.mrf.mxu0 }
 0x11a   :  { %v847_v50 = vpack.c.bf16 %v712_v22, %v712_v22  ;;  %vm689_vm8 = vcmp.ge.f32.partialorder %v660_v45, 0.0  ;;  %v698_v51 = vmul.f32 0.01, %v660_v45  ;;  %v999_v52 = vpop.f32.mrf.mxu1 }
 0x11b   :  { %v664_v53 = vpop.f32.mrf.mxu0 }
 0x11c   :  { %758 = vst [vmem:[%s1344_s3 + $0x20] sm:$0xf] %v847_v50  ;;  %v707_v55 = vsel %vm689_vm8, %v660_v45, %v698_v51  ;;  %v665_v56 = vadd.f32 %v664_v53, %v593_v48 }
 0x11d   :  { %v856_v57 = vpack.c.bf16 %v707_v55, %v706_v54  ;;  %v990_v21 = vpop.f32.mrf.mxu0 }
 0x11e   :  { %v699_v58 = vmul.f32 0.01, %v665_v56  ;;  %vm690_vm9 = vcmp.ge.f32.partialorder %v665_v56, 0.0 }
 0x11f   :  { %868 = vst [vmem:[%s1344_s3 + $0x8] sm:$0xff] %v856_v57   ;;  %v667_v33 = vpop.f32.mrf.mxu0 }
 0x120   :  { %v668_v59 = vadd.f32 %v667_v33, %v596_v23  ;;  %v708_v62 = vsel %vm690_vm9, %v665_v56, %v699_v58 }
 0x121   :  { %v991_v60 = vpop.f32.mrf.mxu0 }
 0x122   :  { %vm691_vm10 = vcmp.ge.f32.partialorder %v668_v59, 0.0  ;;  %v700_v61 = vmul.f32 0.01, %v668_v59 }
 0x124   :  { %v709_v63 = vsel %vm691_vm10, %v668_v59, %v700_v61 }
 0x125   :  { %v861_v0 = vpack.c.bf16 %v709_v63, %v708_v62 }
 0x127   :  { %869 = vst [vmem:[%s1344_s3 + $0x10] sm:$0xff] %v861_v0  }

</bundles_post_ra>
